<compile_context>
chip_gen: v7x
topology: tpu7x:2x2x1
jax: 0.10.0
libtpu: 0.0.40
codegen_flags: <defaults>
</compile_context>

<pallas_src>
import functools

import jax
import jax.numpy as jnp
from jax.experimental import pallas as pl
from jax.experimental.pallas import tpu as pltpu

IN_FEATURES = 28 * 28      # 784 (full last dim of x -> no K padding needed)
HIDDEN = 256
OUT_FEATURES = 1
DEFAULT_TB = 2048          # batch tile (rows); re-budget VMEM before going >4096
VMEM_LIMIT_BYTES = 48 * 1024 * 1024


def _discriminator_kernel(x_ref, w1_ref, b1_ref, w2_ref, b2_ref, o_ref):
    # Layer 1 on the MXU: cast the streamed f32 block to bf16 right before the
    # dot (keeps the MXU on the fast bf16 path, critical on v5e), f32 accumulate.
    x_bf = x_ref[...].astype(jnp.bfloat16)
    h = jnp.dot(x_bf, w1_ref[...], preferred_element_type=jnp.float32)
    # Bias + ReLU in f32 on the VPU.
    h = jnp.maximum(h + b1_ref[...], 0.0)
    # Layer 2 (256 -> 1) is degenerate for the MXU: VPU multiply + lane
    # reduction (XLU) instead, keeping the MXU path free for the big matmul.
    z = jnp.sum(h * w2_ref[...], axis=-1, keepdims=True) + b2_ref[0, 0]
    # Sigmoid: exp and the approximate reciprocal both go to the EUP slot.
    o_ref[...] = pl.reciprocal(1.0 + jnp.exp(-z), approx=True).astype(o_ref.dtype)


@functools.partial(jax.jit, static_argnames=("tb",))
def discriminator_forward(x, w1, b1, w2, b2, *, tb=DEFAULT_TB):
    """x: (B, 1, 28, 28) or (B, 784) float32. Returns (B, 1) float32."""
    xf = x.reshape(-1, IN_FEATURES)          # same semantics as x.view(-1, 784)
    B = xf.shape[0]

    # Batch tile: multiple of 8 sublanes, capped at `tb`; tail block is partial.
    tb_eff = min(tb, pl.cdiv(B, 8) * 8)
    num_tiles = pl.cdiv(B, tb_eff)

    # One-time, tiny wrapper-side conversions (weights only; x is untouched).
    w1_bf = w1.astype(jnp.bfloat16)                       # (784, 256), ~392 KiB
    b1_2d = b1.reshape(1, HIDDEN).astype(jnp.float32)
    w2_row = w2.reshape(1, HIDDEN).astype(jnp.float32)    # (256, 1) -> lane row
    b2_2d = b2.reshape(1, 1).astype(jnp.float32)

    out = pl.pallas_call(
        _discriminator_kernel,
        out_shape=jax.ShapeDtypeStruct((B, OUT_FEATURES), jnp.float32),
        grid=(num_tiles,),
        in_specs=[
            pl.BlockSpec((tb_eff, IN_FEATURES), lambda i: (i, 0)),   # x: streamed f32
            pl.BlockSpec((IN_FEATURES, HIDDEN), lambda i: (0, 0)),   # W1: resident bf16
            pl.BlockSpec((1, HIDDEN), lambda i: (0, 0)),             # b1: resident
            pl.BlockSpec((1, HIDDEN), lambda i: (0, 0)),             # w2: resident
            pl.BlockSpec(memory_space=pltpu.MemorySpace.SMEM),       # b2: SMEM scalar
        ],
        out_specs=pl.BlockSpec((tb_eff, OUT_FEATURES), lambda i: (i, 0)),
        compiler_params=pltpu.CompilerParams(
            dimension_semantics=("parallel",),
            vmem_limit_bytes=VMEM_LIMIT_BYTES),
    )(xf, w1_bf, b1_2d, w2_row, b2_2d)

    return out


def init_params(key):
    """Deterministic init matching nn.Linear's U(-1/sqrt(fan_in), 1/sqrt(fan_in))."""
    k1, k2, k3, k4 = jax.random.split(key, 4)
    bound1 = 1.0 / jnp.sqrt(jnp.float32(IN_FEATURES))
    bound2 = 1.0 / jnp.sqrt(jnp.float32(HIDDEN))
    # Stored transposed relative to torch (in, out) so the kernel does x @ W.
    w1 = jax.random.uniform(k1, (IN_FEATURES, HIDDEN), jnp.float32, -bound1, bound1)
    b1 = jax.random.uniform(k2, (HIDDEN,), jnp.float32, -bound1, bound1)
    w2 = jax.random.uniform(k3, (HIDDEN, OUT_FEATURES), jnp.float32, -bound2, bound2)
    b2 = jax.random.uniform(k4, (OUT_FEATURES,), jnp.float32, -bound2, bound2)
    return w1, b1, w2, b2


if __name__ == "__main__":
    key = jax.random.PRNGKey(0)
    k_params, k_x = jax.random.split(key)
    w1, b1, w2, b2 = init_params(k_params)

    # Small deterministic input, NCHW like a 28x28 grayscale MNIST batch.
    x = jax.random.normal(k_x, (2, 1, 28, 28), dtype=jnp.float32)

    out = discriminator_forward(x, w1, b1, w2, b2)
    out = jax.block_until_ready(out)

    # Pure-JAX reference with the same bf16-rounded MXU operands, f32 accumulate.
    xf = x.reshape(-1, IN_FEATURES)
    h_ref = jnp.dot(xf.astype(jnp.bfloat16), w1.astype(jnp.bfloat16),
                    preferred_element_type=jnp.float32)
    h_ref = jnp.maximum(h_ref + b1, 0.0)
    ref = jax.nn.sigmoid(h_ref @ w2 + b2)

    assert out.shape == (2, 1)
    # Tolerance covers bf16 matmul rounding + the EUP approximate reciprocal.
    assert jnp.allclose(out, ref, atol=2e-3, rtol=2e-3)

    print("KERNEL_OK")
</pallas_src>

<mosaic_0001>
module attributes {stable_mosaic.version = 11 : i64} {
  func.func @_discriminator_kernel(%arg0: i32, %arg1: memref<8x784xf32, #tpu.memory_space<vmem>>, %arg2: memref<784x256xbf16, #tpu.memory_space<vmem>>, %arg3: memref<1x256xf32, #tpu.memory_space<vmem>>, %arg4: memref<1x256xf32, #tpu.memory_space<vmem>>, %arg5: memref<1x1xf32, #tpu.memory_space<smem>>, %arg6: memref<8x1xf32, #tpu.memory_space<vmem>>) attributes {dimension_semantics = [#tpu.dimension_semantics<parallel>], iteration_bounds = array<i64: 1>, scalar_prefetch = 0 : i64, scratch_operands = 0 : i64, tpu.core_type = #tpu.core_type<tc>, window_params = [{transform_indices = @transform_0, window_bounds = array<i64: 8, 784>}, {pipeline_mode = #tpu.pipeline_mode<synchronous>, transform_indices = @transform_1, window_bounds = array<i64: 784, 256>}, {pipeline_mode = #tpu.pipeline_mode<synchronous>, transform_indices = @transform_2, window_bounds = array<i64: 1, 256>}, {pipeline_mode = #tpu.pipeline_mode<synchronous>, transform_indices = @transform_3, window_bounds = array<i64: 1, 256>}, {transform_indices = @transform_4, window_bounds = array<i64: 1, 1>}, {transform_indices = @transform_5, window_bounds = array<i64: 8, 1>}]} {
    %c0 = arith.constant 0 : index
    %c0_0 = arith.constant 0 : index
    %0 = vector.load %arg1[%c0, %c0_0] : memref<8x784xf32, #tpu.memory_space<vmem>>, vector<8x784xf32>
    %1 = arith.truncf %0 : vector<8x784xf32> to vector<8x784xbf16>
    %c0_1 = arith.constant 0 : index
    %c0_2 = arith.constant 0 : index
    %2 = vector.load %arg2[%c0_1, %c0_2] : memref<784x256xbf16, #tpu.memory_space<vmem>>, vector<784x256xbf16>
    %cst = arith.constant dense<0.000000e+00> : vector<8x256xf32>
    %3 = tpu.matmul %1, %2, %cst {dimension_numbers = #tpu.dot_dimension_numbers<[1], [0], [0], [1], [0, 0, 1, 1], [], []>} : vector<8x784xbf16>, vector<784x256xbf16>, vector<8x256xf32> -> vector<8x256xf32>
    %c0_3 = arith.constant 0 : index
    %c0_4 = arith.constant 0 : index
    %4 = vector.load %arg3[%c0_3, %c0_4] : memref<1x256xf32, #tpu.memory_space<vmem>>, vector<1x256xf32>
    %5 = vector.broadcast %4 : vector<1x256xf32> to vector<8x256xf32>
    %6 = arith.addf %3, %5 : vector<8x256xf32>
    %cst_5 = arith.constant 0.000000e+00 : f32
    %7 = vector.broadcast %cst_5 : f32 to vector<8x256xf32>
    %8 = arith.maximumf %6, %7 : vector<8x256xf32>
    %c0_6 = arith.constant 0 : index
    %c0_7 = arith.constant 0 : index
    %9 = vector.load %arg4[%c0_6, %c0_7] : memref<1x256xf32, #tpu.memory_space<vmem>>, vector<1x256xf32>
    %10 = vector.broadcast %9 : vector<1x256xf32> to vector<8x256xf32>
    %11 = arith.mulf %8, %10 : vector<8x256xf32>
    %cst_8 = arith.constant dense<0.000000e+00> : vector<8xf32>
    %12 = vector.multi_reduction <add>, %11, %cst_8 [1] : vector<8x256xf32> to vector<8xf32>
    %13 = vector.shape_cast %12 : vector<8xf32> to vector<8x1xf32>
    %c0_9 = arith.constant 0 : index
    %c0_10 = arith.constant 0 : index
    %14 = memref.load %arg5[%c0_9, %c0_10] : memref<1x1xf32, #tpu.memory_space<smem>>
    %15 = vector.broadcast %14 : f32 to vector<8x1xf32>
    %16 = arith.addf %13, %15 : vector<8x1xf32>
    %cst_11 = arith.constant 0.000000e+00 : f32
    %17 = vector.broadcast %cst_11 : f32 to vector<8x1xf32>
    %18 = arith.subf %17, %16 : vector<8x1xf32>
    %19 = math.exp %18 : vector<8x1xf32>
    %cst_12 = arith.constant 1.000000e+00 : f32
    %20 = vector.broadcast %cst_12 : f32 to vector<8x1xf32>
    %21 = arith.addf %20, %19 : vector<8x1xf32>
    %22 = tpu.reciprocal %21 {approx = true} : vector<8x1xf32> -> vector<8x1xf32>
    %c0_13 = arith.constant 0 : index
    %c0_14 = arith.constant 0 : index
    %23 = vector.load %arg6[%c0_13, %c0_14] : memref<8x1xf32, #tpu.memory_space<vmem>>, vector<8x1xf32>
    tpu.vector_store %arg6[%c0_13, %c0_14], %22 {strides = array<i32>} : memref<8x1xf32, #tpu.memory_space<vmem>>, vector<8x1xf32>,
    return
  }
  func.func @transform_0(%arg0: i32) -> (i32, i32) {
    %c0_i32 = arith.constant 0 : i32
    %c0_i32_0 = arith.constant 0 : i32
    return %arg0, %c0_i32 : i32, i32
  }
  func.func @transform_1(%arg0: i32) -> (i32, i32) {
    %c0_i32 = arith.constant 0 : i32
    %c0_i32_0 = arith.constant 0 : i32
    %c0_i32_1 = arith.constant 0 : i32
    return %c0_i32, %c0_i32_0 : i32, i32
  }
  func.func @transform_2(%arg0: i32) -> (i32, i32) {
    %c0_i32 = arith.constant 0 : i32
    %c0_i32_0 = arith.constant 0 : i32
    %c0_i32_1 = arith.constant 0 : i32
    return %c0_i32, %c0_i32_0 : i32, i32
  }
  func.func @transform_3(%arg0: i32) -> (i32, i32) {
    %c0_i32 = arith.constant 0 : i32
    %c0_i32_0 = arith.constant 0 : i32
    %c0_i32_1 = arith.constant 0 : i32
    return %c0_i32, %c0_i32_0 : i32, i32
  }
  func.func @transform_4(%arg0: i32) -> (i32, i32) {
    %c0_i32 = arith.constant 0 : i32
    %c0_i32_0 = arith.constant 0 : i32
    %c0_i32_1 = arith.constant 0 : i32
    return %c0_i32, %c0_i32_0 : i32, i32
  }
  func.func @transform_5(%arg0: i32) -> (i32, i32) {
    %c0_i32 = arith.constant 0 : i32
    %c0_i32_0 = arith.constant 0 : i32
    return %arg0, %c0_i32 : i32, i32
  }
}

</mosaic_0001>

<bundles_post_ra>
// kernel: discriminator_forward.1
= control target key start
LH: loop header
LB: loop body
LE: loop exit
PB: predicated region body
PF: predicated region fallthrough
CT: control target
= control target key end

     0   :  { %v1235_v19 = vmov 1983009808   ;;  %v45_v21 = vlaneseq  ;;  %vm723_vm0 = vcmask 130048   ;;  %vm918_vm1 = vcmask 7168   ;;  %s1616_s0 = inlined_call_operand.vmem [shape: f32[2,784], index: 0, kind: input, shape index: {}]   ;;  %s1617_s1 = inlined_call_operand.vmem [shape: bf16[784,256], index: 1, kind: input, shape index: {}]   ;;  %s1618_s2 = inlined_call_operand.vmem [shape: f32[1,256], index: 2, kind: input, shape index: {}]   ;;  %s1619_s3 = inlined_call_operand.vmem [shape: f32[1,256], index: 3, kind: input, shape index: {}]   ;;  %s1620_s4 = inlined_call_operand.<no memory space> [shape: f32[1,1], index: 4, kind: input, shape index: {}]   ;;  %s1621_s5 = inlined_call_operand.vmem [shape: f32[2,1], index: 5, kind: output, shape index: {}]  }
   0x1   :  { %v1072_v0 = vld [vmem:[%s1617_s1 + $0x4] ss:$8 sps:$4 sm:$0xff]   ;;  %v1074_v1 = vld [vmem:[%s1617_s1] ss:$8 sps:$4 sm:$0xff]   ;;  %v1075_v2 = vld [vmem:[%s1617_s1 + $0x14] ss:$8 sps:$4 sm:$0xff]   ;;  %v43_v20 = vunpack.c.l.s4 %v1235_v19 }
   0x2   :  { %727 = vmatprep.subr.bf16.mxu1 %v1072_v0  ;;  %v1077_v3 = vld [vmem:[%s1617_s1 + $0x10] ss:$8 sps:$4 sm:$0xff]   ;;  %v1078_v4 = vld [vmem:[%s1617_s1 + $0x24] ss:$8 sps:$4 sm:$0xff]   ;;  %v1080_v5 = vld [vmem:[%s1617_s1 + $0x20] ss:$8 sps:$4 sm:$0xff]  }
   0x3   :  { %728 = vmatpush1.bf16.msra.mxu1 %v1074_v1  ;;  %v1081_v6 = vld [vmem:[%s1617_s1 + $0x34] ss:$8 sps:$4 sm:$0xff]   ;;  %v1083_v7 = vld [vmem:[%s1617_s1 + $0x30] ss:$8 sps:$4 sm:$0xff]   ;;  %v1084_v8 = vld [vmem:[%s1617_s1 + $0x44] ss:$8 sps:$4 sm:$0xff]   ;;  %v44_v26 = vunpack.c.0.s8 %v43_v20 }
   0x4   :  { %729 = vmatprep.subr.bf16.mxu1 %v1075_v2  ;;  %v1102_v9 = vld [vmem:[%s1617_s1 + $0x204] ss:$8 sps:$4 sm:$0xff]   ;;  %v1086_v10 = vld [vmem:[%s1617_s1 + $0x40] ss:$8 sps:$4 sm:$0xff]   ;;  %v1087_v11 = vld [vmem:[%s1617_s1 + $0x54] ss:$8 sps:$4 sm:$0xff]  }
   0x5   :  { %v1106_v12 = vld [vmem:[%s1617_s1 + $0x200] ss:$8 sps:$4 sm:$0xff]   ;;  %809 = vmatprep.subr.bf16.mxu0 %v1102_v9  ;;  %v1108_v13 = vld [vmem:[%s1617_s1 + $0x214] ss:$8 sps:$4 sm:$0xff]   ;;  %v1089_v14 = vld [vmem:[%s1617_s1 + $0x50] ss:$8 sps:$4 sm:$0xff]  }
   0x6   :  { %810 = vmatpush1.bf16.msra.mxu0 %v1106_v12  ;;  %v1112_v15 = vld [vmem:[%s1617_s1 + $0x210] ss:$8 sps:$4 sm:$0xff]   ;;  %v1114_v16 = vld [vmem:[%s1617_s1 + $0x224] ss:$8 sps:$4 sm:$0xff]   ;;  %v1118_v18 = vld [vmem:[%s1617_s1 + $0x220] ss:$8 sps:$4 sm:$0xff]  }
   0x7   :  { %730 = vmatpush1.bf16.msra.mxu1 %v1077_v3  ;;  %811 = vmatprep.subr.bf16.mxu0 %v1108_v13  ;;  %v1090_v17 = vld [vmem:[%s1617_s1 + $0x64] ss:$8 sps:$4 sm:$0xff]   ;;  %v1120_v22 = vld [vmem:[%s1617_s1 + $0x234] ss:$8 sps:$4 sm:$0xff]   ;;  %v1092_v23 = vld [vmem:[%s1617_s1 + $0x60] ss:$8 sps:$4 sm:$0xff]  }
   0x8   :  { %731 = vmatprep.subr.bf16.mxu1 %v1078_v4  ;;  %v1093_v24 = vld [vmem:[%s1617_s1 + $0x74] ss:$8 sps:$4 sm:$0xff]   ;;  %v1124_v25 = vld [vmem:[%s1617_s1 + $0x230] ss:$8 sps:$4 sm:$0xff]   ;;  %v1336_v27 = vshrl.u32 %v45_v21, 7 }
   0x9   :  { %v1126_v28 = vld [vmem:[%s1617_s1 + $0x244] ss:$8 sps:$4 sm:$0xff]   ;;  %v1095_v29 = vld [vmem:[%s1617_s1 + $0x70] ss:$8 sps:$4 sm:$0xff]   ;;  %v1098_v31 = vld [vmem:[%s1617_s1 + $0x80] ss:$8 sps:$4 sm:$0xff]  }
   0xa   :  { %812 = vmatpush1.bf16.msra.mxu0 %v1112_v15  ;;  %v1096_v30 = vld [vmem:[%s1617_s1 + $0x84] ss:$8 sps:$4 sm:$0xff]   ;;  %v1130_v32 = vld [vmem:[%s1617_s1 + $0x240] ss:$8 sps:$4 sm:$0xff]   ;;  %v1354_v33 = vsub.s32 %v44_v26, %v1336_v27  ;;  %v1099_v34 = vld [vmem:[%s1617_s1 + $0x94] ss:$8 sps:$4 sm:$0xff]  }
   0xb   :  { %732 = vmatpush1.bf16.msra.mxu1 %v1080_v5  ;;  %813 = vmatprep.subr.bf16.mxu0 %v1114_v16  ;;  %v1132_v35 = vld [vmem:[%s1617_s1 + $0x254] ss:$8 sps:$4 sm:$0xff]   ;;  %v1140_v36 = vld [vmem:[%s1616_s0] ss:$14 sps:$4 sm:$0xff]  }
   0xc   :  { %733 = vmatprep.subr.bf16.mxu1 %v1081_v6  ;;  %v1142_v37 = vld [vmem:[%s1616_s0 + $0x4] ss:$14 sps:$4 sm:$0xff]   ;;  %v1143_v38 = vld [vmem:[%s1616_s0 + $0x1c] ss:$14 sps:$4 sm:$0xff]   ;;  %v1145_v39 = vld [vmem:[%s1616_s0 + $0x20] ss:$14 sps:$4 sm:$0xff]   ;;  %v48_v41 = vrot.slane %v1140_v36, %v1354_v33 }
   0xd   :  { %v1136_v40 = vld [vmem:[%s1617_s1 + $0x250] ss:$8 sps:$4 sm:$0xff]   ;;  %v1138_v42 = vld [vmem:[%s1617_s1 + $0x264] ss:$8 sps:$4 sm:$0xff]   ;;  %v62_v43 = vrot.slane %v1143_v38, %v1354_v33  ;;  %v55_v44 = vrot.slane %v1142_v37, %v1354_v33  ;;  %v69_v45 = vrot.slane %v1145_v39, %v1354_v33  ;;  %v1149_v50 = vld [vmem:[%s1617_s1 + $0x260] ss:$8 sps:$4 sm:$0xff]  }
   0xe   :  { %814 = vmatpush1.bf16.msra.mxu0 %v1118_v18  ;;  %v1101_v46 = vld [vmem:[%s1617_s1 + $0x90] ss:$8 sps:$4 sm:$0xff]   ;;  %v1104_v47 = vld [vmem:[%s1617_s1 + $0xa4] ss:$8 sps:$4 sm:$0xff]   ;;  %v1150_v52 = vld [vmem:[%s1617_s1 + $0x274] ss:$8 sps:$4 sm:$0xff]  }
   0xf   :  { %734 = vmatpush1.bf16.msra.mxu1 %v1083_v7  ;;  %815 = vmatprep.subr.bf16.mxu0 %v1120_v22  ;;  %v71_v48 = vcombine.high %v48_v41, %v62_v43  ;;  %v1390_v49 = vcombine.low %v55_v44, %v69_v45  ;;  %v1107_v53 = vld [vmem:[%s1617_s1 + $0xa0] ss:$8 sps:$4 sm:$0xff]   ;;  %v1110_v54 = vld [vmem:[%s1617_s1 + $0xb4] ss:$8 sps:$4 sm:$0xff]   ;;  %v1155_v55 = vld [vmem:[%s1617_s1 + $0x270] ss:$8 sps:$4 sm:$0xff]   ;;  %v70_v9 = vcombine.low %v48_v41, %v62_v43 }
  0x10   :  { %735 = vmatprep.subr.bf16.mxu1 %v1084_v8  ;;  %v1156_v56 = vld [vmem:[%s1617_s1 + $0x284] ss:$8 sps:$4 sm:$0xff]   ;;  %v1113_v57 = vld [vmem:[%s1617_s1 + $0xb0] ss:$8 sps:$4 sm:$0xff]   ;;  %v1161_v59 = vld [vmem:[%s1617_s1 + $0x280] ss:$8 sps:$4 sm:$0xff]  }
  0x11   :  { %v117_v51 = vpack.c.bf16 %v71_v48, %v71_v48  ;;  %v1116_v58 = vld [vmem:[%s1617_s1 + $0xc4] ss:$8 sps:$4 sm:$0xff]   ;;  %v1162_v60 = vld [vmem:[%s1617_s1 + $0x294] ss:$8 sps:$4 sm:$0xff]   ;;  %v1119_v61 = vld [vmem:[%s1617_s1 + $0xc0] ss:$8 sps:$4 sm:$0xff]   ;;  %v116_v16 = vpack.c.bf16 %v70_v9, %v70_v9 }
  0x12   :  { %816 = vmatpush1.bf16.msra.mxu0 %v1124_v25  ;;  %v1122_v62 = vld [vmem:[%s1617_s1 + $0xd4] ss:$8 sps:$4 sm:$0xff]   ;;  %v1167_v63 = vld [vmem:[%s1617_s1 + $0x290] ss:$8 sps:$4 sm:$0xff]   ;;  %v1168_v0 = vld [vmem:[%s1617_s1 + $0x2a4] ss:$8 sps:$4 sm:$0xff]  }
  0x13   :  { %736 = vmatpush1.bf16.msra.mxu1 %v1086_v10  ;;  %817 = vmatprep.subr.bf16.mxu0 %v1126_v28  ;;  %v1125_v1 = vld [vmem:[%s1617_s1 + $0xd0] ss:$8 sps:$4 sm:$0xff]   ;;  %v1128_v2 = vld [vmem:[%s1617_s1 + $0xe4] ss:$8 sps:$4 sm:$0xff]   ;;  %v1173_v3 = vld [vmem:[%s1617_s1 + $0x2a0] ss:$8 sps:$4 sm:$0xff]  }
  0x14   :  { %737 = vmatprep.subr.bf16.mxu1 %v1087_v11  ;;  %759 = vmatprep.mubr.bf16.mxu1 %v117_v51  ;;  %v1174_v4 = vld [vmem:[%s1617_s1 + $0x2b4] ss:$8 sps:$4 sm:$0xff]   ;;  %v1131_v5 = vld [vmem:[%s1617_s1 + $0xe0] ss:$8 sps:$4 sm:$0xff]   ;;  %v1179_v7 = vld [vmem:[%s1617_s1 + $0x2b0] ss:$8 sps:$4 sm:$0xff]   ;;  %v73_v11 = vcombine.high %v55_v44, %v69_v45 }
  0x15   :  { %v1134_v6 = vld [vmem:[%s1617_s1 + $0xf4] ss:$8 sps:$4 sm:$0xff]   ;;  %v1137_v8 = vld [vmem:[%s1617_s1 + $0xf0] ss:$8 sps:$4 sm:$0xff]   ;;  %v1180_v10 = vld [vmem:[%s1617_s1 + $0x2c4] ss:$8 sps:$4 sm:$0xff]  }
  0x16   :  { %818 = vmatpush1.bf16.msra.mxu0 %v1130_v32  ;;  %v1148_v12 = vld [vmem:[%s1617_s1 + $0x104] ss:$8 sps:$4 sm:$0xff]   ;;  %v1204_v13 = vld [vmem:[%s1616_s0 + $0x8] ss:$14 sps:$4 sm:$0xff]   ;;  %v119_v21 = vpack.c.bf16 %v73_v11, %v73_v11  ;;  %v1236_v48 = vmov 0  }
  0x17   :  { %738 = vmatpush1.bf16.msra.mxu1 %v1089_v14  ;;  %819 = vmatprep.subr.bf16.mxu0 %v1132_v35  ;;  %v1185_v14 = vld [vmem:[%s1617_s1 + $0x2c0] ss:$8 sps:$4 sm:$0xff]   ;;  %v1207_v15 = vld [vmem:[%s1616_s0 + $0x24] ss:$14 sps:$4 sm:$0xff]   ;;  %v84_v18 = vrot.slane %v1204_v13, %v1354_v33  ;;  %v225_v13 = vsub.s32 0, %v1336_v27 }
  0x18   :  { %739 = vmatprep.subr.bf16.mxu1 %v1090_v17  ;;  %v1186_v17 = vld [vmem:[%s1617_s1 + $0x2d4] ss:$8 sps:$4 sm:$0xff]   ;;  %v1146_v19 = vld [vmem:[%s1617_s1 + $0x100] ss:$8 sps:$4 sm:$0xff]   ;;  %v98_v20 = vrot.slane %v1207_v15, %v1354_v33  ;;  %v1192_v25 = vld [vmem:[%s1617_s1 + $0x2e4] ss:$8 sps:$4 sm:$0xff]  }
  0x19   :  { %v1154_v22 = vld [vmem:[%s1617_s1 + $0x114] ss:$8 sps:$4 sm:$0xff]   ;;  %v1152_v26 = vld [vmem:[%s1617_s1 + $0x110] ss:$8 sps:$4 sm:$0xff]   ;;  %v1158_v32 = vld [vmem:[%s1617_s1 + $0x120] ss:$8 sps:$4 sm:$0xff]  }
  0x1a   :  { %820 = vmatpush1.bf16.msra.mxu0 %v1136_v40  ;;  %v106_v35 = vcombine.low %v84_v18, %v98_v20  ;;  %v1203_v36 = vld [vmem:[%s1617_s1 + $0x2f0] ss:$8 sps:$4 sm:$0xff]   ;;  %v1218_v37 = vld [vmem:[%s1617_s1 + $0x304] ss:$8 sps:$4 sm:$0xff]   ;;  %v1216_v43 = vld [vmem:[%s1617_s1 + $0x300] ss:$8 sps:$4 sm:$0xff]  }
  0x1b   :  { %740 = vmatpush1.bf16.msra.mxu1 %v1092_v23  ;;  %821 = vmatprep.subr.bf16.mxu0 %v1138_v42  ;;  %v1191_v23 = vld [vmem:[%s1617_s1 + $0x2d0] ss:$8 sps:$4 sm:$0xff]   ;;  %v1172_v39 = vld [vmem:[%s1617_s1 + $0x144] ss:$8 sps:$4 sm:$0xff]   ;;  %v1170_v44 = vld [vmem:[%s1617_s1 + $0x140] ss:$8 sps:$4 sm:$0xff]  }
  0x1c   :  { %741 = vmatprep.subr.bf16.mxu1 %v1093_v24  ;;  %v107_v24 = vcombine.high %v84_v18, %v98_v20  ;;  %v1164_v38 = vld [vmem:[%s1617_s1 + $0x130] ss:$8 sps:$4 sm:$0xff]   ;;  %v1209_v41 = vld [vmem:[%s1616_s0 + $0x28] ss:$14 sps:$4 sm:$0x33]   ;;  %v120_v42 = vpack.c.bf16 %v106_v35, %v106_v35  ;;  %v229_v15 = vsub.s32 1, %v1336_v27 }
  0x1d   :  { %v1206_v40 = vld [vmem:[%s1616_s0 + $0xc] ss:$14 sps:$4 sm:$0x33]   ;;  %v1178_v45 = vld [vmem:[%s1617_s1 + $0x154] ss:$8 sps:$4 sm:$0xff]  }
  0x1e   :  { %822 = vmatpush1.bf16.msra.mxu0 %v1149_v50  ;;  %v121_v28 = vpack.c.bf16 %v107_v24, %v107_v24  ;;  %v1176_v50 = vld [vmem:[%s1617_s1 + $0x150] ss:$8 sps:$4 sm:$0xff]   ;;  %v1184_v51 = vld [vmem:[%s1617_s1 + $0x164] ss:$8 sps:$4 sm:$0xff]  }
  0x1f   :  { %742 = vmatpush1.bf16.msra.mxu1 %v1095_v29  ;;  %823 = vmatprep.subr.bf16.mxu0 %v1150_v52  ;;  %v1160_v29 = vld [vmem:[%s1617_s1 + $0x124] ss:$8 sps:$4 sm:$0xff]  }
  0x20   :  { %743 = vmatprep.subr.bf16.mxu1 %v1096_v30  ;;  %v1197_v30 = vld [vmem:[%s1617_s1 + $0x2e0] ss:$8 sps:$4 sm:$0xff]   ;;  %841 = vmatprep.mubr.bf16.mxu0 %v121_v28 }
  0x22   :  { %824 = vmatpush1.bf16.msra.mxu0 %v1155_v55  ;;  %v1188_v55 = vld [vmem:[%s1617_s1 + $0x170] ss:$8 sps:$4 sm:$0xff]  }
  0x23   :  { %744 = vmatpush1.bf16.msra.mxu1 %v1098_v31  ;;  %825 = vmatprep.subr.bf16.mxu0 %v1156_v56  ;;  %v1198_v31 = vld [vmem:[%s1617_s1 + $0x2f4] ss:$8 sps:$4 sm:$0xff]   ;;  %v1196_v56 = vld [vmem:[%s1617_s1 + $0x184] ss:$8 sps:$4 sm:$0xff]  }
  0x24   :  { %745 = vmatprep.subr.bf16.mxu1 %v1099_v34  ;;  %v1166_v34 = vld [vmem:[%s1617_s1 + $0x134] ss:$8 sps:$4 sm:$0xff]  }
  0x26   :  { %826 = vmatpush1.bf16.msra.mxu0 %v1161_v59  ;;  %v1200_v59 = vld [vmem:[%s1617_s1 + $0x190] ss:$8 sps:$4 sm:$0xff]  }
  0x27   :  { %746 = vmatpush1.bf16.msra.mxu1 %v1101_v46  ;;  %827 = vmatprep.subr.bf16.mxu0 %v1162_v60  ;;  %v91_v46 = vrot.slane %v1206_v40, %v1354_v33  ;;  %v1212_v60 = vld [vmem:[%s1617_s1 + $0x1a4] ss:$8 sps:$4 sm:$0xff]  }
  0x28   :  { %747 = vmatprep.subr.bf16.mxu1 %v1104_v47  ;;  %v105_v47 = vrot.slane %v1209_v41, %v1354_v33  ;;  %v1182_v33 = vld [vmem:[%s1617_s1 + $0x160] ss:$8 sps:$4 sm:$0xff]  }
  0x2a   :  { %828 = vmatpush1.bf16.msra.mxu0 %v1167_v63  ;;  %v108_v52 = vcombine.low %v91_v46, %v105_v47  ;;  %v1213_v63 = vld [vmem:[%s1617_s1 + $0x1b0] ss:$8 sps:$4 sm:$0xff]  }
  0x2b   :  { %748 = vmatpush1.bf16.msra.mxu1 %v1107_v53  ;;  %829 = vmatprep.subr.bf16.mxu0 %v1168_v0  ;;  %v1190_v53 = vld [vmem:[%s1617_s1 + $0x174] ss:$8 sps:$4 sm:$0xff]   ;;  %v1221_v0 = vld [vmem:[%s1617_s1 + $0x1c4] ss:$8 sps:$4 sm:$0xff]  }
  0x2c   :  { %749 = vmatprep.subr.bf16.mxu1 %v1110_v54  ;;  %v122_v54 = vpack.c.bf16 %v108_v52, %v108_v52 }
  0x2e   :  { %830 = vmatpush1.bf16.msra.mxu0 %v1173_v3  ;;  %v1222_v3 = vld [vmem:[%s1617_s1 + $0x1d0] ss:$8 sps:$4 sm:$0xff]  }
  0x2f   :  { %750 = vmatpush1.bf16.msra.mxu1 %v1113_v57  ;;  %831 = vmatprep.subr.bf16.mxu0 %v1174_v4  ;;  %v1194_v57 = vld [vmem:[%s1617_s1 + $0x180] ss:$8 sps:$4 sm:$0xff]   ;;  %v1227_v4 = vld [vmem:[%s1617_s1 + $0x1e4] ss:$8 sps:$4 sm:$0xff]  }
  0x30   :  { %751 = vmatprep.subr.bf16.mxu1 %v1116_v58  ;;  %v1202_v58 = vld [vmem:[%s1617_s1 + $0x194] ss:$8 sps:$4 sm:$0xff]  }
  0x32   :  { %832 = vmatpush1.bf16.msra.mxu0 %v1179_v7  ;;  %v1228_v7 = vld [vmem:[%s1617_s1 + $0x1f0] ss:$8 sps:$4 sm:$0xff]  }
  0x33   :  { %752 = vmatpush1.bf16.msra.mxu1 %v1119_v61  ;;  %833 = vmatprep.subr.bf16.mxu0 %v1180_v10  ;;  %v1210_v61 = vld [vmem:[%s1617_s1 + $0x1a0] ss:$8 sps:$4 sm:$0xff]  }
  0x34   :  { %753 = vmatprep.subr.bf16.mxu1 %v1122_v62  ;;  %v1215_v62 = vld [vmem:[%s1617_s1 + $0x1b4] ss:$8 sps:$4 sm:$0xff]  }
  0x36   :  { %834 = vmatpush1.bf16.msra.mxu0 %v1185_v14  ;;  %v221_v14 = vld [vmem:[%s1618_s2] sm:$0x3] }
  0x37   :  { %754 = vmatpush1.bf16.msra.mxu1 %v1125_v1  ;;  %835 = vmatprep.subr.bf16.mxu0 %v1186_v17  ;;  %v1219_v1 = vld [vmem:[%s1617_s1 + $0x1c0] ss:$8 sps:$4 sm:$0xff]   ;;  %v230_v17 = vrot.slane %v221_v14, %v229_v15 }
  0x38   :  { %755 = vmatprep.subr.bf16.mxu1 %v1128_v2  ;;  %v1224_v2 = vld [vmem:[%s1617_s1 + $0x1d4] ss:$8 sps:$4 sm:$0xff]  }
  0x3a   :  { %836 = vmatpush1.bf16.msra.mxu0 %v1191_v23 }
  0x3b   :  { %756 = vmatpush1.bf16.msra.mxu1 %v1131_v5  ;;  %837 = vmatprep.subr.bf16.mxu0 %v1192_v25  ;;  %v1225_v5 = vld [vmem:[%s1617_s1 + $0x1e0] ss:$8 sps:$4 sm:$0xff]  }
  0x3c   :  { %757 = vmatprep.subr.bf16.mxu1 %v1134_v6  ;;  %v1230_v6 = vld [vmem:[%s1617_s1 + $0x1f4] ss:$8 sps:$4 sm:$0xff]  }
  0x3e   :  { %838 = vmatpush1.bf16.msra.mxu0 %v1197_v30 }
  0x3f   :  { %758 = vmatpush1.bf16.msra.mxu1 %v1137_v8  ;;  %839 = vmatprep.subr.bf16.mxu0 %v1198_v31  ;;  %v118_v8 = vpack.c.bf16 %v1390_v49, %v1390_v49  ;;  %v893_v49 = vld [vmem:[%s1619_s3] sm:$0x3] }
  0x40   :  { %768 = vmatprep.subr.bf16.mxu1 %v1148_v12  ;;  %v898_v25 = vrot.slane %v893_v49, %v225_v13  ;;  %v902_v28 = vrot.slane %v893_v49, %v229_v15 }
  0x42   :  { %760 = vmatmul.mubr.bf16.vlgmr.msra.gmra.mrb[0].mxu1 %v116_v16  ;;  %840 = vmatpush1.bf16.msra.mxu0 %v1203_v36  ;;  %v226_v16 = vrot.slane %v221_v14, %v225_v13 }
  0x43   :  { %769 = vmatpush1.bf16.msra.mxu1 %v1146_v19  ;;  %800 = vmatprep.mubr.bf16.mxu1 %v119_v21 }
  0x44   :  { %770 = vmatprep.subr.bf16.mxu1 %v1154_v22  ;;  %850 = vmatprep.subr.bf16.mxu0 %v1218_v37 }
  0x45   :  { %842 = vmatmul.mubr.bf16.vlgmr.msra.gmra.mrb[0].mxu0 %v120_v42 }
  0x46   :  { %851 = vmatpush1.bf16.msra.mxu0 %v1216_v43  ;;  %882 = vmatprep.mubr.bf16.mxu0 %v1236_v48 }
  0x47   :  { %771 = vmatpush1.bf16.msra.mxu1 %v1152_v26 }
  0x48   :  { %772 = vmatprep.subr.bf16.mxu1 %v1160_v29 }
  0x4b   :  { %773 = vmatpush1.bf16.msra.mxu1 %v1158_v32 }
  0x4c   :  { %774 = vmatprep.subr.bf16.mxu1 %v1166_v34  ;;  %v911_v34 = vstv %s1620_s4 }
  0x4f   :  { %775 = vmatpush1.bf16.msra.mxu1 %v1164_v38 }
  0x50   :  { %776 = vmatprep.subr.bf16.mxu1 %v1172_v39 }
  0x51   :  { %1057 = vmatmul.mubr.msk.bf16.vlgmr.msra.gmra.mrb[0].mxu0 %vm723_vm0, %v122_v54 }
  0x53   :  { %777 = vmatpush1.bf16.msra.mxu1 %v1170_v44 }
  0x54   :  { %778 = vmatprep.subr.bf16.mxu1 %v1178_v45 }
  0x57   :  { %779 = vmatpush1.bf16.msra.mxu1 %v1176_v50 }
  0x58   :  { %780 = vmatprep.subr.bf16.mxu1 %v1184_v51 }
  0x5b   :  { %781 = vmatpush1.bf16.msra.mxu1 %v1182_v33 }
  0x5c   :  { %782 = vmatprep.subr.bf16.mxu1 %v1190_v53 }
  0x5f   :  { %783 = vmatpush1.bf16.msra.mxu1 %v1188_v55 }
  0x60   :  { %784 = vmatprep.subr.bf16.mxu1 %v1196_v56 }
  0x63   :  { %785 = vmatpush1.bf16.msra.mxu1 %v1194_v57 }
  0x64   :  { %786 = vmatprep.subr.bf16.mxu1 %v1202_v58 }
  0x67   :  { %787 = vmatpush1.bf16.msra.mxu1 %v1200_v59 }
  0x68   :  { %788 = vmatprep.subr.bf16.mxu1 %v1212_v60 }
  0x6b   :  { %789 = vmatpush1.bf16.msra.mxu1 %v1210_v61 }
  0x6c   :  { %790 = vmatprep.subr.bf16.mxu1 %v1215_v62 }
  0x6f   :  { %791 = vmatpush1.bf16.msra.mxu1 %v1213_v63 }
  0x70   :  { %792 = vmatprep.subr.bf16.mxu1 %v1221_v0 }
  0x73   :  { %793 = vmatpush1.bf16.msra.mxu1 %v1219_v1 }
  0x74   :  { %794 = vmatprep.subr.bf16.mxu1 %v1224_v2 }
  0x77   :  { %795 = vmatpush1.bf16.msra.mxu1 %v1222_v3 }
  0x78   :  { %796 = vmatprep.subr.bf16.mxu1 %v1227_v4 }
  0x7b   :  { %797 = vmatpush1.bf16.msra.mxu1 %v1225_v5 }
  0x7c   :  { %798 = vmatprep.subr.bf16.mxu1 %v1230_v6 }
  0x7f   :  { %799 = vmatpush1.bf16.msra.mxu1 %v1228_v7 }
  0x82   :  { %801 = vmatmul.mubr.bf16.vlgmr.msra.gmra.mrb[0].mxu1 %v118_v8 }
 0x124   :  { %v884_v9 = vpop.f32.mrb[0].mxu0 }
 0x125   :  { %v886_v10 = vpop.f32.mrb[1].mxu0 }
 0x126   :  { %v888_v11 = vpop.f32.mrb[2].mxu0 }
 0x127   :  { %v889_v12 = vpop.f32.mrb[3].mxu0 }
 0x155   :  { %v802_v18 = vpop.f32.mrb[0].mxu1 }
 0x156   :  { %v1058_v19 = vadd.f32 %v802_v18, %v226_v16  ;;  %v804_v20 = vpop.f32.mrb[1].mxu1 }
 0x157   :  { %v1060_v21 = vadd.f32 %v804_v20, %v230_v17  ;;  %v806_v22 = vpop.f32.mrb[2].mxu1 }
 0x158   :  { %v1059_v23 = vadd.f32 %v1058_v19, %v884_v9  ;;  %v807_v24 = vpop.f32.mrb[3].mxu1 }
 0x159   :  { %v1061_v26 = vadd.f32 %v1060_v21, %v886_v10 }
 0x15a   :  { %v891_v29 = vmax.f32 %v1059_v23, 0.0 }
 0x15b   :  { %v892_v30 = vmax.f32 %v1061_v26, 0.0 }
 0x15c   :  { %v905_v31 = vmul.f32 %v898_v25, %v891_v29 }
 0x15d   :  { %v906_v27 = vmul.f32 %v902_v28, %v892_v30 }
 0x15f   :  { %v907_v32 = vadd.f32 %v906_v27, %v905_v31 }
 0x161   :  { %908 = vadd.xlane.f32.xlu0 %v907_v32 }
 0x1ee   :  { %v909_v35 = vpop.xlane.xlu0 %908 }
 0x1ef   :  { %v912_v36 = vadd.f32 %v911_v34, %v909_v35 }
 0x1f1   :  { %v913_v37 = vsub.f32 0.0, %v912_v36 }
 0x1f3   :  { %v914_v38 = vmul.f32 1.442695, %v913_v37 }
 0x1f5   :  { %1231 = vpow2.f32 %v914_v38 }
 0x1ff   :  { %v1232_v39 = vpop.eup %1231 }
 0x200   :  { %v916_v40 = vadd.f32 1.0, %v1232_v39 }
 0x202   :  { %1233 = vrcp.f32 %v916_v40 }
 0x20c   :  { %v1234_v41 = vpop.eup %1233 }
 0x20d   :  { %919 = vst.msk [vmem:[#allocation3] sm:$0xff] %vm918_vm1, %v1234_v41 }
 0x214   :  { %v937_v42 = vld [vmem:[#allocation3] sm:$0x3] }
 0x215   :  { %938 = vst [vmem:[%s1621_s5] sm:$0x3] %v937_v42 }

</bundles_post_ra>
